<compile_context>
chip_gen: v7x
topology: tpu7x:2x2x1
jax: 0.10.0
libtpu: 0.0.40
codegen_flags: <defaults>
</compile_context>

<pallas_src>
import functools

import jax
import jax.numpy as jnp
from jax.experimental import pallas as pl
from jax.experimental.pallas import tpu as pltpu


def _round_up(x, m):
    return ((x + m - 1) // m) * m


def _complex_conv_kernel(pre_ref, pim_ref, wt_ref, wb_ref, b_ref, o_ref, acc_ref):
    # acc[tm, N] += P_re @ W_top + P_im @ W_bot   (shared f32 accumulator).
    # Columns [0:Cp) are the real part, [Cp:2Cp) the imag part; bias
    # (precombined b_re-b_im / b_re+b_im) is added once, in f32, at the end.
    k = pl.program_id(1)

    @pl.when(k == 0)
    def _():
        acc_ref[...] = jnp.zeros_like(acc_ref)

    acc_ref[...] += (
        jnp.dot(pre_ref[...], wt_ref[...], preferred_element_type=jnp.float32)
        + jnp.dot(pim_ref[...], wb_ref[...], preferred_element_type=jnp.float32))

    @pl.when(k == pl.num_programs(1) - 1)
    def _():
        o_ref[...] = acc_ref[...] + b_ref[...]


def _im2col(x, kh, kw, stride, padding, k_pad):
    """x: [B, C, H, W] -> patches [B*Ho*Wo, k_pad], columns ordered (C, kh, kw)
    and zero-padded from C*kh*kw up to k_pad.  Cast x to the compute dtype
    BEFORE calling so the materialized patch matrix is narrow in HBM."""
    B, C, H, W = x.shape
    xp = jnp.pad(x, ((0, 0), (0, 0), (padding, padding), (padding, padding)))
    Ho = (H + 2 * padding - kh) // stride + 1
    Wo = (W + 2 * padding - kw) // stride + 1
    cols = []
    for i in range(kh):
        for j in range(kw):
            cols.append(xp[:, :, i:i + stride * Ho:stride, j:j + stride * Wo:stride])
    cols = jnp.stack(cols, axis=0).reshape(kh, kw, B, C, Ho, Wo)
    cols = cols.transpose(2, 4, 5, 3, 0, 1)          # [B, Ho, Wo, C, kh, kw]
    p = cols.reshape(B * Ho * Wo, C * kh * kw)
    K = C * kh * kw
    if k_pad > K:                                    # folded into the same copy by XLA fusion
        p = jnp.pad(p, ((0, 0), (0, k_pad - K)))
    return p, Ho, Wo


def _vmem_capacity_bytes():
    try:
        return int(pltpu.get_tpu_info().vmem_capacity_bytes)
    except Exception:
        return 64 * 1024 * 1024      # conservative (v7x-sized) fallback


def complex_conv(x, w_re, b_re, w_im, b_im, *, stride=1, padding=0,
                 tm=1024, compute_dtype=jnp.bfloat16, channels_last_output=False):
    """x: [B, 2, Cin, H, W]; w_*: [Cout, Cin, kh, kw]; b_*: [Cout].

    Returns [B, 2, Cout, Ho, Wo] (PyTorch layout), or [B, Ho, Wo, 2, Cout]
    when channels_last_output=True (skips the final HBM transpose).
    """
    B, two, Cin, H, W = x.shape
    assert two == 2
    Cout, _, kh, kw = w_re.shape
    K = Cin * kh * kw

    Ho = (H + 2 * padding - kh) // stride + 1
    Wo = (W + 2 * padding - kw) // stride + 1
    M = B * Ho * Wo

    # Lane-dense output: pad Cout so N = 2*Cp is a multiple of 128.
    Cp = _round_up(max(Cout, 64), 64)
    N = 2 * Cp

    # ---- per-generation tile planning --------------------------------------
    in_bytes = jnp.dtype(compute_dtype).itemsize
    vmem_cap = _vmem_capacity_bytes()                       # 128 MiB v5e/v6e, 64 MiB v7x
    vmem_limit = min(int(0.75 * vmem_cap), 100 * 1024 * 1024)
    budget = int(0.6 * vmem_limit)                          # pipelining headroom

    # >= 2 M steps when possible so the "parallel" axis shards across both
    # TensorCores on v7x; clamp to the caller hint.
    tm = max(256, min(_round_up(tm, 256), _round_up(pl.cdiv(M, 2), 256)))

    def vmem_est(tm_, tk_):
        return (2 * 2 * tm_ * tk_ * in_bytes     # P_re / P_im, double-buffered
                + 2 * 2 * tk_ * N * in_bytes     # W_top / W_bot, double-buffered
                + 2 * 1 * N * 4                  # bias
                + 2 * tm_ * N * 4                # output tile, double-buffered
                + tm_ * N * 4)                   # f32 accumulator scratch

    nk, tk = 1, _round_up(K, 128)
    while vmem_est(tm, tk) > budget and tk > 128:            # shrink K chunk first
        nk += 1
        tk = _round_up(pl.cdiv(K, nk), 128)
    while vmem_est(tm, tk) > budget and tm > 256:            # then shrink the M tile
        tm = _round_up(tm // 2, 256)
    nk = pl.cdiv(K, tk)                                      # minimal chunk count
    Kp = nk * tk                                             # padded contraction dim

    # ---- build operands (cast BEFORE the big im2col materialization) -------
    xc = x.astype(compute_dtype)
    p_re, _, _ = _im2col(xc[:, 0], kh, kw, stride, padding, Kp)   # [M, Kp]
    p_im, _, _ = _im2col(xc[:, 1], kh, kw, stride, padding, Kp)   # [M, Kp]

    f32 = jnp.float32
    wre_m = w_re.reshape(Cout, K).T.astype(f32)              # [K, Cout]
    wim_m = w_im.reshape(Cout, K).T.astype(f32)

    w_top = jnp.zeros((Kp, N), f32)
    w_top = w_top.at[:K, :Cout].set(wre_m).at[:K, Cp:Cp + Cout].set(wim_m)
    w_bot = jnp.zeros((Kp, N), f32)
    w_bot = w_bot.at[:K, :Cout].set(-wim_m).at[:K, Cp:Cp + Cout].set(wre_m)
    w_top = w_top.astype(compute_dtype)
    w_bot = w_bot.astype(compute_dtype)

    bc = jnp.zeros((1, N), f32)
    bc = bc.at[0, :Cout].set(b_re.astype(f32) - b_im.astype(f32))
    bc = bc.at[0, Cp:Cp + Cout].set(b_re.astype(f32) + b_im.astype(f32))

    # ---- pallas_call: M (parallel, partial tail OK) x K (arbitrary) --------
    grid = (pl.cdiv(M, tm), nk)

    out = pl.pallas_call(
        _complex_conv_kernel,
        out_shape=jax.ShapeDtypeStruct((M, N), jnp.float32),   # unpadded M: tail stores masked
        grid_spec=pltpu.PrefetchScalarGridSpec(
            num_scalar_prefetch=0,
            grid=grid,
            in_specs=[
                pl.BlockSpec((tm, tk), lambda i, k: (i, k)),    # P_re
                pl.BlockSpec((tm, tk), lambda i, k: (i, k)),    # P_im
                pl.BlockSpec((tk, N), lambda i, k: (k, 0)),     # W_top (grid-invariant in i)
                pl.BlockSpec((tk, N), lambda i, k: (k, 0)),     # W_bot (grid-invariant in i)
                pl.BlockSpec((1, N), lambda i, k: (0, 0)),      # bias  (grid-invariant)
            ],
            out_specs=pl.BlockSpec((tm, N), lambda i, k: (i, 0)),
            scratch_shapes=[pltpu.VMEM((tm, N), jnp.float32)],
        ),
        compiler_params=pltpu.CompilerParams(
            dimension_semantics=("parallel", "arbitrary"),
            vmem_limit_bytes=vmem_limit),
    )(p_re, p_im, w_top, w_bot, bc)

    # [M, 2*Cp] -> [B, Ho, Wo, 2, Cout]
    out = out.reshape(B, Ho, Wo, 2, Cp)[..., :Cout]
    if channels_last_output:
        return out
    return out.transpose(0, 3, 4, 1, 2)              # PyTorch layout [B, 2, Cout, Ho, Wo]


# ----------------------------- reference ------------------------------------
def _ref_conv2d(x, w, b, stride, padding):
    out = jax.lax.conv_general_dilated(
        x, w, window_strides=(stride, stride),
        padding=[(padding, padding), (padding, padding)],
        dimension_numbers=("NCHW", "OIHW", "NCHW"))
    return out + b.reshape(1, -1, 1, 1)


def _ref_complex_conv(x, w_re, b_re, w_im, b_im, stride, padding):
    real = (_ref_conv2d(x[:, 0], w_re, b_re, stride, padding)
            - _ref_conv2d(x[:, 1], w_im, b_im, stride, padding))
    imag = (_ref_conv2d(x[:, 1], w_re, b_re, stride, padding)
            + _ref_conv2d(x[:, 0], w_im, b_im, stride, padding))
    return jnp.stack((real, imag), axis=1)


if __name__ == "__main__":
    # Small shapes consistent with the module: B=2, Cin=4, Cout=8, 16x16, k=3, pad=1
    B, Cin, Cout, H, W = 2, 4, 8, 16, 16
    kh = kw = 3
    stride, padding = 1, 1

    key = jax.random.PRNGKey(0)
    kx, kwr, kbr, kwi, kbi = jax.random.split(key, 5)

    x = jax.random.normal(kx, (B, 2, Cin, H, W), dtype=jnp.float32)
    # PyTorch-like uniform fan-in init.
    fan_in = Cin * kh * kw
    bound = 1.0 / (fan_in ** 0.5)
    w_re = jax.random.uniform(kwr, (Cout, Cin, kh, kw), jnp.float32, -bound, bound)
    b_re = jax.random.uniform(kbr, (Cout,), jnp.float32, -bound, bound)
    w_im = jax.random.uniform(kwi, (Cout, Cin, kh, kw), jnp.float32, -bound, bound)
    b_im = jax.random.uniform(kbi, (Cout,), jnp.float32, -bound, bound)

    ref = _ref_complex_conv(x, w_re, b_re, w_im, b_im, stride, padding)

    # Production path: bf16 MXU inputs, f32 accumulation.  The planner clamps
    # tm to 256 here (M=512) so the demo grid has 2 M-steps (exercises
    # pipelining / v7x dual-TensorCore sharding).
    fn = jax.jit(functools.partial(complex_conv, stride=stride, padding=padding,
                                   compute_dtype=jnp.bfloat16))
    out = jax.block_until_ready(fn(x, w_re, b_re, w_im, b_im))
    assert out.shape == (B, 2, Cout, H, W), out.shape
    assert jnp.allclose(out, ref, atol=2e-2, rtol=2e-2), "bf16 path mismatch vs reference"

    # f32 cross-check of the split-accumulator math at tight tolerance.
    fn32 = jax.jit(functools.partial(complex_conv, stride=stride, padding=padding,
                                     compute_dtype=jnp.float32))
    out32 = jax.block_until_ready(fn32(x, w_re, b_re, w_im, b_im))
    assert jnp.allclose(out32, ref, atol=1e-4, rtol=1e-4), "f32 path mismatch vs reference"

    print("KERNEL_OK")
</pallas_src>

<mosaic_0001>
module attributes {stable_mosaic.version = 11 : i64} {
  func.func @_complex_conv_kernel(%arg0: i32, %arg1: i32, %arg2: memref<256x128xbf16, #tpu.memory_space<vmem>>, %arg3: memref<256x128xbf16, #tpu.memory_space<vmem>>, %arg4: memref<128x128xbf16, #tpu.memory_space<vmem>>, %arg5: memref<128x128xbf16, #tpu.memory_space<vmem>>, %arg6: memref<1x128xf32, #tpu.memory_space<vmem>>, %arg7: memref<256x128xf32, #tpu.memory_space<vmem>>, %arg8: memref<256x128xf32, #tpu.memory_space<vmem>>) attributes {dimension_semantics = [#tpu.dimension_semantics<parallel>, #tpu.dimension_semantics<arbitrary>], iteration_bounds = array<i64: 2, 1>, scalar_prefetch = 0 : i64, scratch_operands = 1 : i64, tpu.core_type = #tpu.core_type<tc>, window_params = [{transform_indices = @transform_0, window_bounds = array<i64: 256, 128>}, {transform_indices = @transform_1, window_bounds = array<i64: 256, 128>}, {transform_indices = @transform_2, window_bounds = array<i64: 128, 128>}, {transform_indices = @transform_3, window_bounds = array<i64: 128, 128>}, {pipeline_mode = #tpu.pipeline_mode<synchronous>, transform_indices = @transform_4, window_bounds = array<i64: 1, 128>}, {transform_indices = @transform_5, window_bounds = array<i64: 256, 128>}]} {
    %c0_i32 = arith.constant 0 : i32
    %0 = arith.cmpi eq, %arg1, %c0_i32 : i32
    %1 = arith.extui %0 : i1 to i32
    %c0_i32_0 = arith.constant 0 : i32
    %2 = arith.cmpi ne, %1, %c0_i32_0 : i32
    scf.if %2 {
      %cst_15 = arith.constant 0.000000e+00 : f32
      %16 = vector.broadcast %cst_15 : f32 to vector<256x128xf32>
      %c0_16 = arith.constant 0 : index
      %c0_17 = arith.constant 0 : index
      %17 = vector.load %arg8[%c0_16, %c0_17] : memref<256x128xf32, #tpu.memory_space<vmem>>, vector<256x128xf32>
      tpu.vector_store %arg8[%c0_16, %c0_17], %16 {strides = array<i32>} : memref<256x128xf32, #tpu.memory_space<vmem>>, vector<256x128xf32>,
    } else {
    }
    %c0 = arith.constant 0 : index
    %c0_1 = arith.constant 0 : index
    %3 = vector.load %arg8[%c0, %c0_1] : memref<256x128xf32, #tpu.memory_space<vmem>>, vector<256x128xf32>
    %c0_2 = arith.constant 0 : index
    %c0_3 = arith.constant 0 : index
    %4 = vector.load %arg2[%c0_2, %c0_3] : memref<256x128xbf16, #tpu.memory_space<vmem>>, vector<256x128xbf16>
    %c0_4 = arith.constant 0 : index
    %c0_5 = arith.constant 0 : index
    %5 = vector.load %arg4[%c0_4, %c0_5] : memref<128x128xbf16, #tpu.memory_space<vmem>>, vector<128x128xbf16>
    %cst = arith.constant dense<0.000000e+00> : vector<256x128xf32>
    %6 = tpu.matmul %4, %5, %cst {dimension_numbers = #tpu.dot_dimension_numbers<[1], [0], [0], [1], [0, 0, 1, 1], [], []>} : vector<256x128xbf16>, vector<128x128xbf16>, vector<256x128xf32> -> vector<256x128xf32>
    %c0_6 = arith.constant 0 : index
    %c0_7 = arith.constant 0 : index
    %7 = vector.load %arg3[%c0_6, %c0_7] : memref<256x128xbf16, #tpu.memory_space<vmem>>, vector<256x128xbf16>
    %c0_8 = arith.constant 0 : index
    %c0_9 = arith.constant 0 : index
    %8 = vector.load %arg5[%c0_8, %c0_9] : memref<128x128xbf16, #tpu.memory_space<vmem>>, vector<128x128xbf16>
    %cst_10 = arith.constant dense<0.000000e+00> : vector<256x128xf32>
    %9 = tpu.matmul %7, %8, %cst_10 {dimension_numbers = #tpu.dot_dimension_numbers<[1], [0], [0], [1], [0, 0, 1, 1], [], []>} : vector<256x128xbf16>, vector<128x128xbf16>, vector<256x128xf32> -> vector<256x128xf32>
    %10 = arith.addf %6, %9 : vector<256x128xf32>
    %11 = arith.addf %3, %10 : vector<256x128xf32>
    %c0_11 = arith.constant 0 : index
    %c0_12 = arith.constant 0 : index
    %12 = vector.load %arg8[%c0_11, %c0_12] : memref<256x128xf32, #tpu.memory_space<vmem>>, vector<256x128xf32>
    tpu.vector_store %arg8[%c0_11, %c0_12], %11 {strides = array<i32>} : memref<256x128xf32, #tpu.memory_space<vmem>>, vector<256x128xf32>,
    %c0_i32_13 = arith.constant 0 : i32
    %13 = arith.cmpi eq, %arg1, %c0_i32_13 : i32
    %14 = arith.extui %13 : i1 to i32
    %c0_i32_14 = arith.constant 0 : i32
    %15 = arith.cmpi ne, %14, %c0_i32_14 : i32
    scf.if %15 {
      %c0_15 = arith.constant 0 : index
      %c0_16 = arith.constant 0 : index
      %16 = vector.load %arg8[%c0_15, %c0_16] : memref<256x128xf32, #tpu.memory_space<vmem>>, vector<256x128xf32>
      %c0_17 = arith.constant 0 : index
      %c0_18 = arith.constant 0 : index
      %17 = vector.load %arg6[%c0_17, %c0_18] : memref<1x128xf32, #tpu.memory_space<vmem>>, vector<1x128xf32>
      %18 = vector.broadcast %17 : vector<1x128xf32> to vector<256x128xf32>
      %19 = arith.addf %16, %18 : vector<256x128xf32>
      %c0_19 = arith.constant 0 : index
      %c0_20 = arith.constant 0 : index
      %20 = vector.load %arg7[%c0_19, %c0_20] : memref<256x128xf32, #tpu.memory_space<vmem>>, vector<256x128xf32>
      tpu.vector_store %arg7[%c0_19, %c0_20], %19 {strides = array<i32>} : memref<256x128xf32, #tpu.memory_space<vmem>>, vector<256x128xf32>,
    } else {
    }
    return
  }
  func.func @transform_0(%arg0: i32, %arg1: i32) -> (i32, i32) {
    %c0_i32 = arith.constant 0 : i32
    return %arg0, %arg1 : i32, i32
  }
  func.func @transform_1(%arg0: i32, %arg1: i32) -> (i32, i32) {
    %c0_i32 = arith.constant 0 : i32
    return %arg0, %arg1 : i32, i32
  }
  func.func @transform_2(%arg0: i32, %arg1: i32) -> (i32, i32) {
    %c0_i32 = arith.constant 0 : i32
    %c0_i32_0 = arith.constant 0 : i32
    return %arg1, %c0_i32 : i32, i32
  }
  func.func @transform_3(%arg0: i32, %arg1: i32) -> (i32, i32) {
    %c0_i32 = arith.constant 0 : i32
    %c0_i32_0 = arith.constant 0 : i32
    return %arg1, %c0_i32 : i32, i32
  }
  func.func @transform_4(%arg0: i32, %arg1: i32) -> (i32, i32) {
    %c0_i32 = arith.constant 0 : i32
    %c0_i32_0 = arith.constant 0 : i32
    %c0_i32_1 = arith.constant 0 : i32
    return %c0_i32, %c0_i32_0 : i32, i32
  }
  func.func @transform_5(%arg0: i32, %arg1: i32) -> (i32, i32) {
    %c0_i32 = arith.constant 0 : i32
    %c0_i32_0 = arith.constant 0 : i32
    return %arg0, %c0_i32 : i32, i32
  }
}

</mosaic_0001>

<bundles_post_ra>
// kernel: complex_conv.1
= control target key start
LH: loop header
LB: loop body
LE: loop exit
PB: predicated region body
PF: predicated region fallthrough
CT: control target
= control target key end

     0   :  { %s1752_s18 = smov 0   ;;  %s1754_s19 = smov 0   ;;  %s1947_s0 = inlined_call_operand.vmem [shape: bf16[512,128], index: 0, kind: input, shape index: {}]   ;;  %s1948_s1 = inlined_call_operand.vmem [shape: bf16[512,128], index: 1, kind: input, shape index: {}]   ;;  %s1949_s2 = inlined_call_operand.vmem [shape: bf16[128,128], index: 2, kind: input, shape index: {}]   ;;  %s1950_s3 = inlined_call_operand.vmem [shape: bf16[128,128], index: 3, kind: input, shape index: {}]   ;;  %s1951_s4 = inlined_call_operand.vmem [shape: f32[1,128], index: 4, kind: input, shape index: {}]   ;;  %s1952_s5 = inlined_call_operand.vmem [shape: f32[512,128], index: 5, kind: output, shape index: {}]  }
   0x1   :  { %s1756_s20 = smov 0  }
   0x2 LB: > { %s27_s21 = sadd.s32 1, %s1716_s19  ;;  %p1392_p0 = scmp.ge.s32.totalorder %s1720_s20, 1  ;;  %s1720_s20 = sphi %s1756_s20, %s15_s20   ;;  %s1716_s19 = sphi %s1754_s19, %s1954_s19   ;;  %s1712_s18 = sphi %s1752_s18, %s1953_s18  }
   0x3   : > { %p29_p1 = scmp.ge.s32.totalorder %s27_s21, 2  ;;  %p243_p2 = scmp.lt.s32.totalorder %s1720_s20, 3 }
   0x5   : > { %s1956_s21 = smov (%p29_p1, %s27_s21), 0  ;;  %p244_p3 = pnand %p1392_p0, %p243_p2 }
   0x6   : > { %v1650_v0 = vld [vmem:[%s1950_s3] sm:$0xff] (!%p244_p3)   ;;  %s1393_s24 = sshll.u32 (!%p244_p3), %s1712_s18, 5  ;;  %v1652_v2 = vld [vmem:[%s1950_s3 + $0x8] sm:$0xff] (!%p244_p3)   ;;  %v1654_v4 = vld [vmem:[%s1950_s3 + $0x10] sm:$0xff] (!%p244_p3)  }
   0x7   : > { %247 = sbr.rel (%p244_p3) target bundleno = 316 (0x13c), region = 40  ;;  %v1651_v1 = vld [vmem:[%s1949_s2] sm:$0xff] (!%p244_p3)   ;;  %1498 = vmatprep.subr.bf16.mxu1 (!%p244_p3), %v1650_v0  ;;  %p293_p4 = scmp.lt.s32.totalorder (!%p244_p3), %s1393_s24, 63  ;;  %v1653_v3 = vld [vmem:[%s1949_s2 + $0x8] sm:$0xff] (!%p244_p3)   ;;  %v1655_v5 = vld [vmem:[%s1949_s2 + $0x10] sm:$0xff] (!%p244_p3)  }
   0x8   : > { %1546 = vmatprep.subr.bf16.mxu0 (!%p244_p3), %v1651_v1  ;;  %1499 = vmatpush3.bf16.msra.mxu1 (!%p244_p3), %v1650_v0  ;;  %v1656_v6 = vld [vmem:[%s1950_s3 + $0x18] sm:$0xff] (!%p244_p3)   ;;  %v1658_v8 = vld [vmem:[%s1950_s3 + $0x20] sm:$0xff] (!%p244_p3)   ;;  %v1660_v10 = vld [vmem:[%s1950_s3 + $0x28] sm:$0xff] (!%p244_p3)  }
   0x9   : > { %1547 = vmatpush3.bf16.msra.mxu0 (!%p244_p3), %v1651_v1  ;;  %1500 = vmatprep.subr.bf16.mxu1 (!%p244_p3), %v1652_v2  ;;  %v1657_v7 = vld [vmem:[%s1949_s2 + $0x18] sm:$0xff] (!%p244_p3)   ;;  %v1659_v9 = vld [vmem:[%s1949_s2 + $0x20] sm:$0xff] (!%p244_p3)   ;;  %v1661_v11 = vld [vmem:[%s1949_s2 + $0x28] sm:$0xff] (!%p244_p3)  }
   0xa   : > { %1548 = vmatprep.subr.bf16.mxu0 (!%p244_p3), %v1653_v3  ;;  %v1662_v14 = vld [vmem:[%s1950_s3 + $0x30] sm:$0xff] (!%p244_p3)   ;;  %v1664_v16 = vld [vmem:[%s1950_s3 + $0x38] sm:$0xff] (!%p244_p3)   ;;  %v1867_v50 = vld [vmem:[%s1951_s4] ss:$0 sm:$0xff] (!%p244_p3) }
   0xb   : > { %v1663_v15 = vld [vmem:[%s1949_s2 + $0x30] sm:$0xff] (!%p244_p3)   ;;  %v1665_v17 = vld [vmem:[%s1949_s2 + $0x38] sm:$0xff] (!%p244_p3)  }
   0xc   : > { %1501 = vmatpush3.bf16.msra.mxu1 (!%p244_p3), %v1652_v2 }
   0xd   : > { %1549 = vmatpush3.bf16.msra.mxu0 (!%p244_p3), %v1653_v3  ;;  %1502 = vmatprep.subr.bf16.mxu1 (!%p244_p3), %v1654_v4 }
   0xe   : > { %s1958_s24 = smov (!%p293_p4, %s1393_s24), 63  ;;  %1550 = vmatprep.subr.bf16.mxu0 %v1655_v5 }
   0xf   : > { %s1394_s14 = sshll.u32 %s1958_s24, 2  ;;  %s1398_s16 = sshll.u32 %s1958_s24, 3 }
  0x10   : > { %1503 = vmatpush3.bf16.msra.mxu1 %v1654_v4  ;;  %s1806_s25 = scalar_lea.vmem %s1948_s1, %s1394_s14  ;;  %s1814_s30 = scalar_lea.vmem %s1947_s0, %s1394_s14 }
  0x11   : > { %1551 = vmatpush3.bf16.msra.mxu0 %v1655_v5  ;;  %1504 = vmatprep.subr.bf16.mxu1 %v1656_v6  ;;  %v1666_v12 = vld [vmem:[%s1806_s25] sm:$0xff]   ;;  %v1668_v18 = vld [vmem:[%s1806_s25 + $0x8] sm:$0xff]   ;;  %v1670_v20 = vld [vmem:[%s1806_s25 + $0x10] sm:$0xff]   ;;  %s1872_s26 = scalar_lea.vmem %s1952_s5, %s1398_s16 }
  0x12   : > { %1552 = vmatprep.subr.bf16.mxu0 %v1657_v7  ;;  %v1667_v13 = vld [vmem:[%s1814_s30] sm:$0xff]   ;;  %1514 = vmatprep.mubr.bf16.mxu1 %v1666_v12  ;;  %v1669_v19 = vld [vmem:[%s1814_s30 + $0x8] sm:$0xff]   ;;  %v1671_v21 = vld [vmem:[%s1814_s30 + $0x10] sm:$0xff]  }
  0x13   : > { %1562 = vmatprep.mubr.bf16.mxu0 %v1667_v13  ;;  %v1672_v22 = vld [vmem:[%s1806_s25 + $0x18] sm:$0xff]   ;;  %v1674_v24 = vld [vmem:[%s1806_s25 + $0x20] sm:$0xff]   ;;  %v1676_v26 = vld [vmem:[%s1806_s25 + $0x28] sm:$0xff]  }
  0x14   : > { %1505 = vmatpush3.bf16.msra.mxu1 %v1656_v6  ;;  %v1673_v23 = vld [vmem:[%s1814_s30 + $0x18] sm:$0xff]   ;;  %v1675_v25 = vld [vmem:[%s1814_s30 + $0x20] sm:$0xff]   ;;  %v1677_v27 = vld [vmem:[%s1814_s30 + $0x28] sm:$0xff]  }
  0x15   : > { %1553 = vmatpush3.bf16.msra.mxu0 %v1657_v7  ;;  %1506 = vmatprep.subr.bf16.mxu1 %v1658_v8  ;;  %v1678_v28 = vld [vmem:[%s1806_s25 + $0x30] sm:$0xff]   ;;  %v1680_v30 = vld [vmem:[%s1806_s25 + $0x38] sm:$0xff]   ;;  %v1682_v32 = vld [vmem:[%s1806_s25 + $0x40] sm:$0xff]  }
  0x16   : > { %1554 = vmatprep.subr.bf16.mxu0 %v1659_v9  ;;  %v1679_v29 = vld [vmem:[%s1814_s30 + $0x30] sm:$0xff]   ;;  %v1681_v31 = vld [vmem:[%s1814_s30 + $0x38] sm:$0xff]   ;;  %v1683_v33 = vld [vmem:[%s1814_s30 + $0x40] sm:$0xff]  }
  0x17   : > { %v1684_v34 = vld [vmem:[%s1806_s25 + $0x48] sm:$0xff]   ;;  %v1686_v36 = vld [vmem:[%s1806_s25 + $0x50] sm:$0xff]   ;;  %v1688_v38 = vld [vmem:[%s1806_s25 + $0x58] sm:$0xff]  }
  0x18   : > { %1507 = vmatpush3.bf16.msra.mxu1 %v1658_v8  ;;  %v1685_v35 = vld [vmem:[%s1814_s30 + $0x48] sm:$0xff]   ;;  %v1687_v37 = vld [vmem:[%s1814_s30 + $0x50] sm:$0xff]   ;;  %v1689_v39 = vld [vmem:[%s1814_s30 + $0x58] sm:$0xff]  }
  0x19   : > { %1555 = vmatpush3.bf16.msra.mxu0 %v1659_v9  ;;  %1508 = vmatprep.subr.bf16.mxu1 %v1660_v10  ;;  %v1690_v40 = vld [vmem:[%s1806_s25 + $0x60] sm:$0xff]   ;;  %v1692_v42 = vld [vmem:[%s1806_s25 + $0x68] sm:$0xff]   ;;  %v1694_v44 = vld [vmem:[%s1806_s25 + $0x70] sm:$0xff]  }
  0x1a   : > { %1556 = vmatprep.subr.bf16.mxu0 %v1661_v11  ;;  %v1691_v41 = vld [vmem:[%s1814_s30 + $0x60] sm:$0xff]   ;;  %v1693_v43 = vld [vmem:[%s1814_s30 + $0x68] sm:$0xff]   ;;  %v1695_v45 = vld [vmem:[%s1814_s30 + $0x70] sm:$0xff]  }
  0x1b   : > { %v1696_v46 = vld [vmem:[%s1806_s25 + $0x78] sm:$0xff]  }
  0x1c   : > { %1509 = vmatpush3.bf16.msra.mxu1 %v1660_v10  ;;  %v1697_v47 = vld [vmem:[%s1814_s30 + $0x78] sm:$0xff]  }
  0x1d   : > { %1557 = vmatpush3.bf16.msra.mxu0 %v1661_v11  ;;  %1510 = vmatprep.subr.bf16.mxu1 %v1662_v14 }
  0x1e   : > { %1558 = vmatprep.subr.bf16.mxu0 %v1663_v15 }
  0x20   : > { %1511 = vmatpush3.bf16.msra.mxu1 %v1662_v14 }
  0x21   : > { %1559 = vmatpush3.bf16.msra.mxu0 %v1663_v15  ;;  %1512 = vmatprep.subr.bf16.mxu1 %v1664_v16 }
  0x22   : > { %1560 = vmatprep.subr.bf16.mxu0 %v1665_v17 }
  0x24   : > { %1513 = vmatpush3.bf16.msra.mxu1 %v1664_v16 }
  0x25   : > { %1561 = vmatpush3.bf16.msra.mxu0 %v1665_v17 }
  0x27   : > { %1515 = vmatmul.mubr.bf16.vlgmr.msra.gmra.mrb[0].mxu1 %v1668_v18 }
  0x28   : > { %1563 = vmatmul.mubr.bf16.vlgmr.msra.gmra.mrb[0].mxu0 %v1669_v19  ;;  %1518 = vmatprep.mubr.bf16.mxu1 %v1670_v20 }
  0x29   : > { %1566 = vmatprep.mubr.bf16.mxu0 %v1671_v21 }
  0x2f   : > { %1519 = vmatmul.mubr.bf16.gmra.mrb[4].mxu1 %v1672_v22 }
  0x30   : > { %1567 = vmatmul.mubr.bf16.gmra.mrb[4].mxu0 %v1673_v23  ;;  %1522 = vmatprep.mubr.bf16.mxu1 %v1674_v24 }
  0x31   : > { %1570 = vmatprep.mubr.bf16.mxu0 %v1675_v25 }
  0x37   : > { %1523 = vmatmul.mubr.bf16.gmra.mrb[8].mxu1 %v1676_v26 }
  0x38   : > { %1571 = vmatmul.mubr.bf16.gmra.mrb[8].mxu0 %v1677_v27  ;;  %1526 = vmatprep.mubr.bf16.mxu1 %v1678_v28 }
  0x39   : > { %1574 = vmatprep.mubr.bf16.mxu0 %v1679_v29 }
  0x3f   : > { %1527 = vmatmul.mubr.bf16.gmra.mrb[12].mxu1 %v1680_v30 }
  0x40   : > { %1575 = vmatmul.mubr.bf16.gmra.mrb[12].mxu0 %v1681_v31  ;;  %1530 = vmatprep.mubr.bf16.mxu1 %v1682_v32 }
  0x41   : > { %1578 = vmatprep.mubr.bf16.mxu0 %v1683_v33 }
  0x47   : > { %1531 = vmatmul.mubr.bf16.gmra.mrb[16].mxu1 %v1684_v34 }
  0x48   : > { %1579 = vmatmul.mubr.bf16.gmra.mrb[16].mxu0 %v1685_v35  ;;  %1534 = vmatprep.mubr.bf16.mxu1 %v1686_v36 }
  0x49   : > { %1582 = vmatprep.mubr.bf16.mxu0 %v1687_v37 }
  0x4f   : > { %1535 = vmatmul.mubr.bf16.gmra.mrb[20].mxu1 %v1688_v38 }
  0x50   : > { %1583 = vmatmul.mubr.bf16.gmra.mrb[20].mxu0 %v1689_v39  ;;  %1538 = vmatprep.mubr.bf16.mxu1 %v1690_v40 }
  0x51   : > { %1586 = vmatprep.mubr.bf16.mxu0 %v1691_v41 }
  0x57   : > { %1539 = vmatmul.mubr.bf16.gmra.mrb[24].mxu1 %v1692_v42 }
  0x58   : > { %1587 = vmatmul.mubr.bf16.gmra.mrb[24].mxu0 %v1693_v43  ;;  %1542 = vmatprep.mubr.bf16.mxu1 %v1694_v44 }
  0x59   : > { %1590 = vmatprep.mubr.bf16.mxu0 %v1695_v45 }
  0x5f   : > { %1543 = vmatmul.mubr.bf16.gmra.mrb[28].mxu1 %v1696_v46 }
  0x60   : > { %1591 = vmatmul.mubr.bf16.gmra.mrb[28].mxu0 %v1697_v47 }
  0xfa   : > { %v1516_v48 = vpop.f32.mrb[0].mxu1 }
  0xfb   : > { %v1564_v49 = vpop.f32.mrb[0].mxu0  ;;  %v671_v51 = vpop.f32.mrb[1].mxu1 }
  0xfc   : > { %v985_v52 = vadd.f32 %v1564_v49, %v1516_v48  ;;  %v976_v53 = vpop.f32.mrb[1].mxu0  ;;  %v1517_v54 = vpop.f32.mrb[2].mxu1 }
  0xfd   : > { %v977_v55 = vadd.f32 %v976_v53, %v671_v51  ;;  %v1565_v56 = vpop.f32.mrb[2].mxu0  ;;  %v674_v57 = vpop.f32.mrb[3].mxu1 }
  0xfe   : > { %v1211_v58 = vadd.f32 %v1867_v50, %v985_v52  ;;  %v988_v59 = vadd.f32 %v1565_v56, %v1517_v54  ;;  %v979_v60 = vpop.f32.mrb[3].mxu0 }
  0xff   : > { %v1209_v61 = vadd.f32 %v1867_v50, %v977_v55  ;;  %v980_v62 = vadd.f32 %v979_v60, %v674_v57 }
 0x100   : > { %1243 = vst [vmem:[%s1872_s26 + $0x10] sm:$0xff] %v1211_v58  ;;  %v1212_v63 = vadd.f32 %v1867_v50, %v988_v59 }
 0x101   : > { %1241 = vst [vmem:[%s1872_s26] sm:$0xff] %v1209_v61  ;;  %v1210_v0 = vadd.f32 %v1867_v50, %v980_v62 }
 0x102   : > { %1244 = vst [vmem:[%s1872_s26 + $0x18] sm:$0xff] %v1212_v63  ;;  %v1520_v1 = vpop.f32.mrb[4].mxu1 }
 0x103   : > { %1242 = vst [vmem:[%s1872_s26 + $0x8] sm:$0xff] %v1210_v0  ;;  %v1568_v2 = vpop.f32.mrb[4].mxu0  ;;  %v687_v3 = vpop.f32.mrb[5].mxu1 }
 0x104   : > { %v1001_v4 = vadd.f32 %v1568_v2, %v1520_v1  ;;  %v992_v5 = vpop.f32.mrb[5].mxu0  ;;  %v1521_v6 = vpop.f32.mrb[6].mxu1 }
 0x105   : > { %v993_v7 = vadd.f32 %v992_v5, %v687_v3  ;;  %v1569_v8 = vpop.f32.mrb[6].mxu0  ;;  %v690_v9 = vpop.f32.mrb[7].mxu1 }
 0x106   : > { %v1215_v10 = vadd.f32 %v1867_v50, %v1001_v4  ;;  %v1004_v11 = vadd.f32 %v1569_v8, %v1521_v6  ;;  %v995_v12 = vpop.f32.mrb[7].mxu0 }
 0x107   : > { %v1213_v13 = vadd.f32 %v1867_v50, %v993_v7  ;;  %v996_v14 = vadd.f32 %v995_v12, %v690_v9 }
 0x108   : > { %1247 = vst [vmem:[%s1872_s26 + $0x30] sm:$0xff] %v1215_v10  ;;  %v1216_v15 = vadd.f32 %v1867_v50, %v1004_v11 }
 0x109   : > { %1245 = vst [vmem:[%s1872_s26 + $0x20] sm:$0xff] %v1213_v13  ;;  %v1214_v16 = vadd.f32 %v1867_v50, %v996_v14 }
 0x10a   : > { %1248 = vst [vmem:[%s1872_s26 + $0x38] sm:$0xff] %v1216_v15  ;;  %v1524_v17 = vpop.f32.mrb[8].mxu1 }
 0x10b   : > { %1246 = vst [vmem:[%s1872_s26 + $0x28] sm:$0xff] %v1214_v16  ;;  %v1572_v18 = vpop.f32.mrb[8].mxu0  ;;  %v703_v19 = vpop.f32.mrb[9].mxu1 }
 0x10c   : > { %v1017_v20 = vadd.f32 %v1572_v18, %v1524_v17  ;;  %v1008_v21 = vpop.f32.mrb[9].mxu0  ;;  %v1525_v22 = vpop.f32.mrb[10].mxu1 }
 0x10d   : > { %v1009_v23 = vadd.f32 %v1008_v21, %v703_v19  ;;  %v1573_v24 = vpop.f32.mrb[10].mxu0  ;;  %v706_v25 = vpop.f32.mrb[11].mxu1 }
 0x10e   : > { %v1219_v26 = vadd.f32 %v1867_v50, %v1017_v20  ;;  %v1020_v27 = vadd.f32 %v1573_v24, %v1525_v22  ;;  %v1011_v28 = vpop.f32.mrb[11].mxu0 }
 0x10f   : > { %v1217_v29 = vadd.f32 %v1867_v50, %v1009_v23  ;;  %v1012_v30 = vadd.f32 %v1011_v28, %v706_v25 }
 0x110   : > { %1251 = vst [vmem:[%s1872_s26 + $0x50] sm:$0xff] %v1219_v26  ;;  %v1220_v31 = vadd.f32 %v1867_v50, %v1020_v27 }
 0x111   : > { %1249 = vst [vmem:[%s1872_s26 + $0x40] sm:$0xff] %v1217_v29  ;;  %v1218_v32 = vadd.f32 %v1867_v50, %v1012_v30 }
 0x112   : > { %1252 = vst [vmem:[%s1872_s26 + $0x58] sm:$0xff] %v1220_v31  ;;  %v1528_v33 = vpop.f32.mrb[12].mxu1 }
 0x113   : > { %1250 = vst [vmem:[%s1872_s26 + $0x48] sm:$0xff] %v1218_v32  ;;  %v1576_v34 = vpop.f32.mrb[12].mxu0  ;;  %v719_v35 = vpop.f32.mrb[13].mxu1 }
 0x114   : > { %v1033_v36 = vadd.f32 %v1576_v34, %v1528_v33  ;;  %v1024_v37 = vpop.f32.mrb[13].mxu0  ;;  %v1529_v38 = vpop.f32.mrb[14].mxu1 }
 0x115   : > { %v1025_v39 = vadd.f32 %v1024_v37, %v719_v35  ;;  %v1577_v40 = vpop.f32.mrb[14].mxu0  ;;  %v722_v41 = vpop.f32.mrb[15].mxu1 }
 0x116   : > { %v1223_v42 = vadd.f32 %v1867_v50, %v1033_v36  ;;  %v1036_v43 = vadd.f32 %v1577_v40, %v1529_v38  ;;  %v1027_v44 = vpop.f32.mrb[15].mxu0 }
 0x117   : > { %v1221_v45 = vadd.f32 %v1867_v50, %v1025_v39  ;;  %v1028_v46 = vadd.f32 %v1027_v44, %v722_v41 }
 0x118   : > { %1255 = vst [vmem:[%s1872_s26 + $0x70] sm:$0xff] %v1223_v42  ;;  %v1224_v47 = vadd.f32 %v1867_v50, %v1036_v43 }
 0x119   : > { %1253 = vst [vmem:[%s1872_s26 + $0x60] sm:$0xff] %v1221_v45  ;;  %v1222_v48 = vadd.f32 %v1867_v50, %v1028_v46 }
 0x11a   : > { %1256 = vst [vmem:[%s1872_s26 + $0x78] sm:$0xff] %v1224_v47  ;;  %v1532_v49 = vpop.f32.mrb[16].mxu1 }
 0x11b   : > { %1254 = vst [vmem:[%s1872_s26 + $0x68] sm:$0xff] %v1222_v48  ;;  %v1580_v51 = vpop.f32.mrb[16].mxu0  ;;  %v735_v52 = vpop.f32.mrb[17].mxu1 }
 0x11c   : > { %v1049_v53 = vadd.f32 %v1580_v51, %v1532_v49  ;;  %v1040_v54 = vpop.f32.mrb[17].mxu0  ;;  %v1533_v55 = vpop.f32.mrb[18].mxu1 }
 0x11d   : > { %v1041_v56 = vadd.f32 %v1040_v54, %v735_v52  ;;  %v1581_v57 = vpop.f32.mrb[18].mxu0  ;;  %v738_v58 = vpop.f32.mrb[19].mxu1 }
 0x11e   : > { %v1227_v59 = vadd.f32 %v1867_v50, %v1049_v53  ;;  %v1052_v60 = vadd.f32 %v1581_v57, %v1533_v55  ;;  %v1043_v61 = vpop.f32.mrb[19].mxu0 }
 0x11f   : > { %v1225_v62 = vadd.f32 %v1867_v50, %v1041_v56  ;;  %v1044_v63 = vadd.f32 %v1043_v61, %v738_v58 }
 0x120   : > { %1259 = vst [vmem:[%s1872_s26 + $0x90] sm:$0xff] %v1227_v59  ;;  %v1228_v0 = vadd.f32 %v1867_v50, %v1052_v60 }
 0x121   : > { %1257 = vst [vmem:[%s1872_s26 + $0x80] sm:$0xff] %v1225_v62  ;;  %v1226_v1 = vadd.f32 %v1867_v50, %v1044_v63 }
 0x122   : > { %1260 = vst [vmem:[%s1872_s26 + $0x98] sm:$0xff] %v1228_v0  ;;  %v1536_v2 = vpop.f32.mrb[20].mxu1 }
 0x123   : > { %1258 = vst [vmem:[%s1872_s26 + $0x88] sm:$0xff] %v1226_v1  ;;  %v1584_v3 = vpop.f32.mrb[20].mxu0  ;;  %v751_v4 = vpop.f32.mrb[21].mxu1 }
 0x124   : > { %v1065_v5 = vadd.f32 %v1584_v3, %v1536_v2  ;;  %v1056_v6 = vpop.f32.mrb[21].mxu0  ;;  %v1537_v7 = vpop.f32.mrb[22].mxu1 }
 0x125   : > { %v1057_v8 = vadd.f32 %v1056_v6, %v751_v4  ;;  %v1585_v9 = vpop.f32.mrb[22].mxu0  ;;  %v754_v10 = vpop.f32.mrb[23].mxu1 }
 0x126   : > { %v1231_v11 = vadd.f32 %v1867_v50, %v1065_v5  ;;  %v1068_v12 = vadd.f32 %v1585_v9, %v1537_v7  ;;  %v1059_v13 = vpop.f32.mrb[23].mxu0 }
 0x127   : > { %v1229_v14 = vadd.f32 %v1867_v50, %v1057_v8  ;;  %v1060_v15 = vadd.f32 %v1059_v13, %v754_v10 }
 0x128   : > { %1263 = vst [vmem:[%s1872_s26 + $0xb0] sm:$0xff] %v1231_v11  ;;  %v1232_v16 = vadd.f32 %v1867_v50, %v1068_v12 }
 0x129   : > { %1261 = vst [vmem:[%s1872_s26 + $0xa0] sm:$0xff] %v1229_v14  ;;  %v1230_v17 = vadd.f32 %v1867_v50, %v1060_v15 }
 0x12a   : > { %1264 = vst [vmem:[%s1872_s26 + $0xb8] sm:$0xff] %v1232_v16  ;;  %v1540_v18 = vpop.f32.mrb[24].mxu1 }
 0x12b   : > { %1262 = vst [vmem:[%s1872_s26 + $0xa8] sm:$0xff] %v1230_v17  ;;  %v1588_v19 = vpop.f32.mrb[24].mxu0  ;;  %v767_v20 = vpop.f32.mrb[25].mxu1 }
 0x12c   : > { %v1081_v21 = vadd.f32 %v1588_v19, %v1540_v18  ;;  %v1072_v22 = vpop.f32.mrb[25].mxu0  ;;  %v1541_v23 = vpop.f32.mrb[26].mxu1 }
 0x12d   : > { %v1073_v24 = vadd.f32 %v1072_v22, %v767_v20  ;;  %v1589_v25 = vpop.f32.mrb[26].mxu0  ;;  %v770_v26 = vpop.f32.mrb[27].mxu1 }
 0x12e   : > { %v1235_v27 = vadd.f32 %v1867_v50, %v1081_v21  ;;  %v1084_v28 = vadd.f32 %v1589_v25, %v1541_v23  ;;  %v1075_v29 = vpop.f32.mrb[27].mxu0 }
 0x12f   : > { %v1233_v30 = vadd.f32 %v1867_v50, %v1073_v24  ;;  %v1076_v31 = vadd.f32 %v1075_v29, %v770_v26 }
 0x130   : > { %1267 = vst [vmem:[%s1872_s26 + $0xd0] sm:$0xff] %v1235_v27  ;;  %v1236_v32 = vadd.f32 %v1867_v50, %v1084_v28 }
 0x131   : > { %1265 = vst [vmem:[%s1872_s26 + $0xc0] sm:$0xff] %v1233_v30  ;;  %v1234_v33 = vadd.f32 %v1867_v50, %v1076_v31 }
 0x132   : > { %1268 = vst [vmem:[%s1872_s26 + $0xd8] sm:$0xff] %v1236_v32  ;;  %v1544_v34 = vpop.f32.mrb[28].mxu1 }
 0x133   : > { %1266 = vst [vmem:[%s1872_s26 + $0xc8] sm:$0xff] %v1234_v33  ;;  %v1592_v35 = vpop.f32.mrb[28].mxu0  ;;  %v783_v36 = vpop.f32.mrb[29].mxu1 }
 0x134   : > { %v1097_v37 = vadd.f32 %v1592_v35, %v1544_v34  ;;  %v1088_v38 = vpop.f32.mrb[29].mxu0  ;;  %v1545_v39 = vpop.f32.mrb[30].mxu1 }
 0x135   : > { %v1089_v40 = vadd.f32 %v1088_v38, %v783_v36  ;;  %v1593_v41 = vpop.f32.mrb[30].mxu0  ;;  %v786_v42 = vpop.f32.mrb[31].mxu1 }
 0x136   : > { %v1239_v43 = vadd.f32 %v1867_v50, %v1097_v37  ;;  %v1100_v44 = vadd.f32 %v1593_v41, %v1545_v39  ;;  %v1091_v45 = vpop.f32.mrb[31].mxu0 }
 0x137   : > { %v1237_v46 = vadd.f32 %v1867_v50, %v1089_v40  ;;  %v1092_v47 = vadd.f32 %v1091_v45, %v786_v42 }
 0x138   : > { %1271 = vst [vmem:[%s1872_s26 + $0xf0] sm:$0xff] %v1239_v43  ;;  %v1240_v48 = vadd.f32 %v1867_v50, %v1100_v44 }
 0x139   : > { %1269 = vst [vmem:[%s1872_s26 + $0xe0] sm:$0xff] %v1237_v46  ;;  %v1238_v49 = vadd.f32 %v1867_v50, %v1092_v47 }
 0x13a   : > { %1272 = vst [vmem:[%s1872_s26 + $0xf8] sm:$0xff] %v1240_v48 }
 0x13b   : > { %1270 = vst [vmem:[%s1872_s26 + $0xe8] sm:$0xff] %v1238_v49 }
 0x13c PF: > { %s15_s20 = sadd.s32 1, %s1720_s20   ;;  %s1953_s18 = smov %s1716_s19 }
 0x13d   : > { %p12_p5 = scmp.ge.s32.totalorder %s15_s20, 4   ;;  %s1954_s19 = smov %s1956_s21 }
 0x13f   :  { %14 = sbr.rel (!%p12_p5) target bundleno = 2 (0x2), region = 87 }

</bundles_post_ra>
